<compile_context>
chip_gen: v7x
topology: tpu7x:2x2x1
jax: 0.10.0
libtpu: 0.0.40
codegen_flags: <defaults>
</compile_context>

<pallas_src>
import jax
import jax.numpy as jnp
from jax.experimental import pallas as pl
from jax.experimental.pallas import tpu as pltpu

IN_FEATURES = 2
OUT_FEATURES = 1
LANES = 128
DEFAULT_TILE_ROWS = 4096  # rows of 128 lanes per grid step (~4 MiB f32 input)


def linear_relu_kernel(w_ref, b_ref, x_ref, o_ref):
    # w_ref: (IN_FEATURES,) f32 SMEM, b_ref: (OUT_FEATURES,) f32 SMEM
    # x_ref: (IN_FEATURES, tile_rows, 128) VMEM   (batch dense on sublane+lane)
    # o_ref: (tile_rows, 128) VMEM
    w0 = w_ref[0]
    w1 = w_ref[1]
    bias = b_ref[0]
    x0 = x_ref[0].astype(jnp.float32)            # (tile_rows, 128)
    x1 = x_ref[1].astype(jnp.float32)            # (tile_rows, 128)
    y = x0 * w0 + x1 * w1 + bias                 # two VPU FMAs + bias
    o_ref[...] = jnp.maximum(y, 0.0).astype(o_ref.dtype)


def _rows_per_tile(rows_total, target_rows):
    """Pick block rows: big (amortize step overhead), multiple of 8 when a
    proper sub-block, and >=2 grid steps when possible (v7x dual-TC)."""
    if rows_total <= 8:
        return rows_total                      # single block == full dim (ok)
    r = min(target_rows, rows_total)
    if r == rows_total:                        # would be a single tile: split
        r = -(-rows_total // 2)
    r = max(8, (r // 8) * 8)                   # multiple of 8 (sublane rule)
    return r


def _vmem_limit_bytes(tile_rows, in_dtype, out_dtype):
    in_blk = IN_FEATURES * tile_rows * LANES * jnp.dtype(in_dtype).itemsize
    out_blk = tile_rows * LANES * jnp.dtype(out_dtype).itemsize
    working = 2 * (in_blk + out_blk)           # double-buffered in + out
    return int(min(max(2 * working, 8 * 2**20), 64 * 2**20))


def linear_relu(x, w, b, *, target_rows_per_tile=DEFAULT_TILE_ROWS,
                out_dtype=None):
    """x: (B, IN) f32/bf16, w: (IN, OUT) f32, b: (OUT,) f32 -> (B, OUT)."""
    B = x.shape[0]
    assert x.shape[1] == IN_FEATURES
    out_dtype = x.dtype if out_dtype is None else jnp.dtype(out_dtype)

    rows_total = pl.cdiv(B, LANES)
    b_pad = rows_total * LANES

    # Feature-major, fully dense layout: (IN, rows, 128). Only pad the batch
    # to a multiple of 128; partial grid tiles are masked by Pallas.
    xt = jnp.transpose(x)
    xt = jnp.pad(xt, ((0, 0), (0, b_pad - B)))
    xt = xt.reshape(IN_FEATURES, rows_total, LANES)

    # OUT_FEATURES == 1 is assumed by the scalar-weight formulation.
    w_flat = w.reshape(IN_FEATURES).astype(jnp.float32)
    b_flat = b.reshape(OUT_FEATURES).astype(jnp.float32)

    tile_rows = _rows_per_tile(rows_total, target_rows_per_tile)
    num_tiles = pl.cdiv(rows_total, tile_rows)

    bytes_accessed = (xt.size * xt.dtype.itemsize
                      + b_pad * out_dtype.itemsize)
    cost = pl.CostEstimate(flops=4 * b_pad, transcendentals=0,
                           bytes_accessed=bytes_accessed)

    out = pl.pallas_call(
        linear_relu_kernel,
        out_shape=jax.ShapeDtypeStruct((rows_total, LANES), out_dtype),
        grid_spec=pltpu.PrefetchScalarGridSpec(
            num_scalar_prefetch=0,
            grid=(num_tiles,),
            in_specs=[
                # Tiny parameter vectors live in SMEM, read as scalars.
                pl.BlockSpec(memory_space=pltpu.MemorySpace.SMEM),
                pl.BlockSpec(memory_space=pltpu.MemorySpace.SMEM),
                # Dense batch tiles, pipelined over the grid.
                pl.BlockSpec((IN_FEATURES, tile_rows, LANES),
                             lambda i: (0, i, 0)),
            ],
            out_specs=pl.BlockSpec((tile_rows, LANES), lambda i: (i, 0)),
        ),
        compiler_params=pltpu.CompilerParams(
            dimension_semantics=("parallel",),
            vmem_limit_bytes=_vmem_limit_bytes(tile_rows, xt.dtype, out_dtype)),
        cost_estimate=cost,
    )(w_flat, b_flat, xt)

    # Back to the PyTorch convention: (B, OUT_FEATURES), padding dropped.
    return out.reshape(b_pad)[:B].reshape(B, OUT_FEATURES)


def _reference(x, w, b):
    return jnp.maximum(x @ w + b.reshape(1, -1), 0.0)


if __name__ == "__main__":
    key = jax.random.PRNGKey(0)
    kx, kw, kb, kx2, kx3 = jax.random.split(key, 5)

    # Deterministic parameter init mimicking nn.Linear(2, 1):
    # uniform(-1/sqrt(in_features), 1/sqrt(in_features))
    bound = 1.0 / (IN_FEATURES ** 0.5)
    w = jax.random.uniform(kw, (IN_FEATURES, OUT_FEATURES),
                           dtype=jnp.float32, minval=-bound, maxval=bound)
    b = jax.random.uniform(kb, (OUT_FEATURES,),
                           dtype=jnp.float32, minval=-bound, maxval=bound)

    # Small batch, single block.
    batch = 8
    x = jax.random.normal(kx, (batch, IN_FEATURES), dtype=jnp.float32)
    out = linear_relu(x, w, b)
    jax.block_until_ready(out)
    assert out.shape == (batch, OUT_FEATURES)
    assert jnp.allclose(out, _reference(x, w, b), atol=1e-5, rtol=1e-5)

    # Non-divisible batch + forced multi-tile grid: exercises the partial last
    # block (Pallas masking) and the "parallel" grid axis.
    batch2 = 1500
    x2 = jax.random.normal(kx2, (batch2, IN_FEATURES), dtype=jnp.float32)
    out2 = linear_relu(x2, w, b, target_rows_per_tile=8)
    jax.block_until_ready(out2)
    assert out2.shape == (batch2, OUT_FEATURES)
    assert jnp.allclose(out2, _reference(x2, w, b), atol=1e-5, rtol=1e-5)

    # bf16 I/O path (halves HBM traffic on v6e/v7x); FMAs stay f32 in-kernel.
    batch3 = 1024
    x3 = jax.random.normal(kx3, (batch3, IN_FEATURES), dtype=jnp.float32)
    x3_bf = x3.astype(jnp.bfloat16)
    out3 = linear_relu(x3_bf, w, b, out_dtype=jnp.bfloat16)
    jax.block_until_ready(out3)
    assert out3.shape == (batch3, OUT_FEATURES)
    ref3 = _reference(x3_bf.astype(jnp.float32), w, b)
    assert jnp.allclose(out3.astype(jnp.float32), ref3, atol=1e-2, rtol=1e-2)

    print("KERNEL_OK")
</pallas_src>

<mosaic_0001>
module attributes {stable_mosaic.version = 11 : i64} {
  func.func @linear_relu_kernel(%arg0: i32, %arg1: memref<2xf32, #tpu.memory_space<smem>>, %arg2: memref<1xf32, #tpu.memory_space<smem>>, %arg3: memref<2x1x128xf32, #tpu.memory_space<vmem>>, %arg4: memref<1x128xf32, #tpu.memory_space<vmem>>) attributes {dimension_semantics = [#tpu.dimension_semantics<parallel>], iteration_bounds = array<i64: 1>, scalar_prefetch = 0 : i64, scratch_operands = 0 : i64, tpu.core_type = #tpu.core_type<tc>, window_params = [{transform_indices = @transform_0, window_bounds = array<i64: 2>}, {transform_indices = @transform_1, window_bounds = array<i64: 1>}, {transform_indices = @transform_2, window_bounds = array<i64: 2, 1, 128>}, {transform_indices = @transform_3, window_bounds = array<i64: 1, 128>}]} {
    %c0 = arith.constant 0 : index
    %0 = memref.load %arg1[%c0] : memref<2xf32, #tpu.memory_space<smem>>
    %c1 = arith.constant 1 : index
    %1 = memref.load %arg1[%c1] : memref<2xf32, #tpu.memory_space<smem>>
    %c0_0 = arith.constant 0 : index
    %2 = memref.load %arg2[%c0_0] : memref<1xf32, #tpu.memory_space<smem>>
    %c0_1 = arith.constant 0 : index
    %c0_2 = arith.constant 0 : index
    %c0_3 = arith.constant 0 : index
    %3 = vector.load %arg3[%c0_1, %c0_2, %c0_3] : memref<2x1x128xf32, #tpu.memory_space<vmem>>, vector<1x1x128xf32>
    %4 = vector.shape_cast %3 : vector<1x1x128xf32> to vector<1x128xf32>
    %c1_4 = arith.constant 1 : index
    %c0_5 = arith.constant 0 : index
    %c0_6 = arith.constant 0 : index
    %5 = vector.load %arg3[%c1_4, %c0_5, %c0_6] : memref<2x1x128xf32, #tpu.memory_space<vmem>>, vector<1x1x128xf32>
    %6 = vector.shape_cast %5 : vector<1x1x128xf32> to vector<1x128xf32>
    %7 = vector.broadcast %0 : f32 to vector<1x128xf32>
    %8 = arith.mulf %4, %7 : vector<1x128xf32>
    %9 = vector.broadcast %1 : f32 to vector<1x128xf32>
    %10 = arith.mulf %6, %9 : vector<1x128xf32>
    %11 = arith.addf %8, %10 : vector<1x128xf32>
    %12 = vector.broadcast %2 : f32 to vector<1x128xf32>
    %13 = arith.addf %11, %12 : vector<1x128xf32>
    %cst = arith.constant 0.000000e+00 : f32
    %14 = vector.broadcast %cst : f32 to vector<1x128xf32>
    %15 = arith.maximumf %13, %14 : vector<1x128xf32>
    %c0_7 = arith.constant 0 : index
    %c0_8 = arith.constant 0 : index
    %16 = vector.load %arg4[%c0_7, %c0_8] : memref<1x128xf32, #tpu.memory_space<vmem>>, vector<1x128xf32>
    tpu.vector_store %arg4[%c0_7, %c0_8], %15 {strides = array<i32>} : memref<1x128xf32, #tpu.memory_space<vmem>>, vector<1x128xf32>,
    return
  }
  func.func @transform_0(%arg0: i32) -> i32 {
    %c0_i32 = arith.constant 0 : i32
    %c0_i32_0 = arith.constant 0 : i32
    return %c0_i32 : i32
  }
  func.func @transform_1(%arg0: i32) -> i32 {
    %c0_i32 = arith.constant 0 : i32
    %c0_i32_0 = arith.constant 0 : i32
    return %c0_i32 : i32
  }
  func.func @transform_2(%arg0: i32) -> (i32, i32, i32) {
    %c0_i32 = arith.constant 0 : i32
    %c0_i32_0 = arith.constant 0 : i32
    %c0_i32_1 = arith.constant 0 : i32
    return %c0_i32, %arg0, %c0_i32_0 : i32, i32, i32
  }
  func.func @transform_3(%arg0: i32) -> (i32, i32) {
    %c0_i32 = arith.constant 0 : i32
    %c0_i32_0 = arith.constant 0 : i32
    return %arg0, %c0_i32 : i32, i32
  }
}

</mosaic_0001>

<bundles_post_ra>
// kernel: tpu_custom_call.1
= control target key start
LH: loop header
LB: loop body
LE: loop exit
PB: predicated region body
PF: predicated region fallthrough
CT: control target
= control target key end

     0   :  { %9 = vsyncpa [#allocation5], 0  ;;  %s147_s0 = inlined_call_operand.vmem [shape: f32[2], index: 0, kind: input, shape index: {}]   ;;  %s148_s1 = inlined_call_operand.<no memory space> [shape: f32[1], index: 1, kind: input, shape index: {}]   ;;  %s149_s2 = inlined_call_operand.vmem [shape: f32[2,1,128], index: 2, kind: input, shape index: {}]   ;;  %s150_s3 = inlined_call_operand.hbm [shape: f32[1,128], index: 3, kind: output, shape index: {}]  }
   0x1   :  { %10 = vsyncpa [#allocation4], 0  ;;  %s17_s14 = sshll.u32 %s147_s0, 4  ;;  %s18_s14 = int_to_ptr.vmem [resolvable:$true] %s17_s14 }
   0x2   :  { %s63_s15 = scalar_lea.vmem %s18_s14, 16  ;;  %p68_p1 = scmp.lt.s32.totalorder %s18_s14, %s18_s14 }
   0x3   :  { %p64_p0 = scmp.ne.s32.totalorder %s18_s14, %s63_s15  ;;  %p69_p2 = scmp.lt.s32.totalorder %s63_s15, %s63_s15 }
   0x5   :  { %p70_p3 = por %p69_p2, %p68_p1 }
   0x7   :  { %p71_p4 = pnand %p70_p3, %p64_p0 }
   0x9   :  { %74 = shalt.err (!%p71_p4)
}
   0xa   :  { %s101_s16 = smov [#allocation3]  }
   0xb   :  { %20 = dma.vmem_to_smem %s18_s14, 16, %s101_s16, [#allocation5]  }
   0xc   :  { %97 = dma.done.wait [#allocation5], 16  }
   0xd   :  { %98 = vsyncadd [#allocation5], 4294967280 }
   0xe   :  { %28 = sfence }
   0xf   :  { %s29_s17 = sld [smem:[#allocation3]]  ;;  %s59_s18 = sld [smem:[#allocation3 + $0x1]]  ;;  %v32_v0 = vld [vmem:[%s149_s2] sm:$0x1]  ;;  %v60_v1 = vld [vmem:[%s149_s2 + $0x1] sm:$0x1]  ;;  %v40_v6 = vstv %s148_s1 }
  0x10   :  { %s102_s24 = smov [#allocation6]  }
  0x11   :  { %s50_s25 = sshll.u32 %s102_s24, 4  ;;  %s51_s25 = int_to_ptr.vmem [resolvable:$true] %s50_s25 }
  0x12   :  { %s75_s26 = scalar_lea.vmem %s51_s25, 16  ;;  %s79_s27 = scalar_lea.vmem %s51_s25, 32 }
  0x13   :  { %p76_p5 = scmp.ne.s32.totalorder %s51_s25, %s75_s26  ;;  %p80_p6 = scmp.lt.s32.totalorder %s51_s25, %s51_s25 }
  0x14   :  { %p81_p7 = scmp.lt.s32.totalorder %s79_s27, %s75_s26 }
  0x15   :  { %v35_v2 = vstv %s29_s17  ;;  %v37_v3 = vstv %s59_s18 }
  0x16   :  { %v36_v4 = vmul.f32 %v35_v2, %v32_v0  ;;  %v38_v5 = vmul.f32 %v60_v1, %v37_v3  ;;  %p82_p8 = por %p81_p7, %p80_p6 }
  0x18   :  { %v39_v7 = vadd.f32 %v38_v5, %v36_v4  ;;  %p83_p9 = pnand %p82_p8, %p76_p5 }
  0x1a   :  { %v41_v8 = vadd.f32 %v40_v6, %v39_v7 }
  0x1c   :  { %v42_v9 = vmax.f32 %v41_v8, 0.0 }
  0x1e   :  { %43 = vst [vmem:[#allocation6] sm:$0x1] %v42_v9 }
  0x1f   :  { %86 = shalt.err (!%p83_p9)
}
  0x20   :  { %s87_s29 = scalar_lea.hbm %s150_s3, 16 }
  0x21   :  { %p88_p10 = scmp.ne.s32.totalorder %s150_s3, %s87_s29  ;;  %p91_p11 = scmp.lt.u32.totalorder %s87_s29, %s150_s3 }
  0x23   :  { %p93_p12 = pnand %p91_p11, %p88_p10 }
  0x25   :  { %96 = shalt.err (!%p93_p12)
}
  0x26   :  { %53 = dma.vmem_to_hbm [thread:$0]  %s51_s25, 16, %s150_s3, [#allocation4]  }
  0x27   :  { %99 = dma.done.wait [#allocation4], 16  }
  0x28   :  { %100 = vsyncadd [#allocation4], 4294967280 }
  0x29   :  { %57 = vsyncpa [#allocation4], 1 }
  0x2a   :  { %58 = vsyncpa [#allocation5], 1 }

</bundles_post_ra>
